<compile_context>
chip_gen: v5e
topology: v5e:2x2
jax: 0.10.0
libtpu: 0.0.40
codegen_flags: <defaults>
</compile_context>

<pallas_src>
import jax
import jax.numpy as jnp
from jax.experimental import pallas as pl
from jax.experimental.pallas import tpu as pltpu

HIDDEN_LAYER = 5
IN_FEATURES = 4
OUT_FEATURES = 2

_LANE = 128


def _round_up(n, m):
    return ((n + m - 1) // m) * m


def _mlp_kernel(x_ref, w1_ref, b1_ref, w2_ref, b2_ref, w3_ref, b3_ref, o_ref):
    # x_ref: (4, TILE_B), batch lane-dense; weights (out, in); biases (out, 1).
    # Three tiny matmuls (M<=5, K<=5, N=TILE_B) + lane-broadcast biases +
    # sigmoids, all fused in VMEM.  Output store is a full unmasked tile.
    x = x_ref[...]
    h1 = jax.nn.sigmoid(
        jnp.dot(w1_ref[...], x, preferred_element_type=jnp.float32) + b1_ref[...])
    h2 = jax.nn.sigmoid(
        jnp.dot(w2_ref[...], h1, preferred_element_type=jnp.float32) + b2_ref[...])
    out = jnp.dot(w3_ref[...], h2, preferred_element_type=jnp.float32) + b3_ref[...]
    o_ref[...] = out.astype(o_ref.dtype)
    # TODO(synk): on v5e the padded MXU panels could be replaced by unrolled VPU
    # broadcast multiply-adds (K<=5); on v6e/v7x the MXU path is already cheap.


def network_forward(x, params, *, max_tile_b=32 * 1024):
    """x: (B, 4) float32. params: torch-layout dict (w: (out,in), b: (out,1))."""
    w1, b1 = params["w1"], params["b1"]
    w2, b2 = params["w2"], params["b2"]
    w3, b3 = params["w3"], params["b3"]

    B = x.shape[0]
    # Batch tile: lane-aligned (multiple of 128), capped so double-buffered
    # tiles stay tiny relative to v7x's 64 MiB VMEM.  B is padded to a multiple
    # of tile_b so every grid step is a full, unmasked, lane-dense tile.
    tile_b = min(_round_up(max_tile_b, _LANE), _round_up(B, _LANE))
    b_pad = _round_up(B, tile_b)

    # Layout plumbing only (outside the kernel): transpose + zero-pad the tail.
    x_t = jnp.pad(x.T, ((0, 0), (0, b_pad - B)))  # (4, b_pad)

    def batch_spec(rows):
        return pl.BlockSpec((rows, tile_b), lambda i: (0, i))

    def const_spec(shape):
        # Constant block index: parameters stay VMEM-resident across all steps.
        return pl.BlockSpec(shape, lambda i: (0, 0))

    out_t = pl.pallas_call(
        _mlp_kernel,
        out_shape=jax.ShapeDtypeStruct((OUT_FEATURES, b_pad), jnp.float32),
        grid_spec=pltpu.PrefetchScalarGridSpec(
            num_scalar_prefetch=0,
            grid=(b_pad // tile_b,),
            in_specs=[
                batch_spec(IN_FEATURES),
                const_spec(w1.shape), const_spec(b1.shape),
                const_spec(w2.shape), const_spec(b2.shape),
                const_spec(w3.shape), const_spec(b3.shape),
            ],
            out_specs=batch_spec(OUT_FEATURES),
        ),
        compiler_params=pltpu.CompilerParams(
            # Independent batch tiles: lets v7x shard the grid across both
            # TensorCores; harmless on single-TC v5e/v6e.
            dimension_semantics=("parallel",),
        ),
    )(x_t, w1, b1, w2, b2, w3, b3)

    return out_t[:, :B].T  # back to (B, 2)


def init_params(key):
    """Deterministic init mimicking nn.Linear default: U(-1/sqrt(fan_in), 1/sqrt(fan_in)).

    Weights kept in torch layout (out_features, in_features); biases (out_features, 1).
    """
    ks = jax.random.split(key, 6)

    def linear(kw, kb, fan_in, fan_out):
        bound = 1.0 / jnp.sqrt(jnp.float32(fan_in))
        w = jax.random.uniform(kw, (fan_out, fan_in), jnp.float32, -bound, bound)
        b = jax.random.uniform(kb, (fan_out, 1), jnp.float32, -bound, bound)
        return w, b

    w1, b1 = linear(ks[0], ks[1], IN_FEATURES, HIDDEN_LAYER)
    w2, b2 = linear(ks[2], ks[3], HIDDEN_LAYER, HIDDEN_LAYER)
    w3, b3 = linear(ks[4], ks[5], HIDDEN_LAYER, OUT_FEATURES)
    return {"w1": w1, "b1": b1, "w2": w2, "b2": b2, "w3": w3, "b3": b3}


def reference_forward(x, params):
    """Pure-JAX reference (matches torch: y = x @ W.T + b)."""
    h1 = jax.nn.sigmoid(x @ params["w1"].T + params["b1"].T)
    h2 = jax.nn.sigmoid(h1 @ params["w2"].T + params["b2"].T)
    return h2 @ params["w3"].T + params["b3"].T


if __name__ == "__main__":
    key = jax.random.PRNGKey(0)
    k_params, k_x1, k_x2 = jax.random.split(key, 3)

    params = init_params(k_params)

    # Small batch (single tile, padded to one lane-aligned block).
    x_small = jax.random.normal(k_x1, (8, IN_FEATURES), dtype=jnp.float32)
    out_small = jax.block_until_ready(network_forward(x_small, params))
    ref_small = reference_forward(x_small, params)
    assert out_small.shape == (8, OUT_FEATURES)
    assert jnp.allclose(out_small, ref_small, atol=2e-5, rtol=1e-4), "mismatch (small batch)"

    # Multi-tile batch with a ragged tail (exercises grid pipelining + padding).
    x_multi = jax.random.normal(k_x2, (1000, IN_FEATURES), dtype=jnp.float32)
    out_multi = jax.block_until_ready(network_forward(x_multi, params, max_tile_b=256))
    ref_multi = reference_forward(x_multi, params)
    assert out_multi.shape == (1000, OUT_FEATURES)
    assert jnp.allclose(out_multi, ref_multi, atol=2e-5, rtol=1e-4), "mismatch (multi-tile batch)"

    print("KERNEL_OK")
</pallas_src>

<mosaic_0001>
module attributes {stable_mosaic.version = 11 : i64} {
  func.func @_mlp_kernel(%arg0: i32, %arg1: memref<4x128xf32, #tpu.memory_space<vmem>>, %arg2: memref<5x4xf32, #tpu.memory_space<vmem>>, %arg3: memref<5x1xf32, #tpu.memory_space<vmem>>, %arg4: memref<5x5xf32, #tpu.memory_space<vmem>>, %arg5: memref<5x1xf32, #tpu.memory_space<vmem>>, %arg6: memref<2x5xf32, #tpu.memory_space<vmem>>, %arg7: memref<2x1xf32, #tpu.memory_space<vmem>>, %arg8: memref<2x128xf32, #tpu.memory_space<vmem>>) attributes {dimension_semantics = [#tpu.dimension_semantics<parallel>], iteration_bounds = array<i64: 1>, scalar_prefetch = 0 : i64, scratch_operands = 0 : i64, tpu.core_type = #tpu.core_type<tc>, window_params = [{transform_indices = @transform_0, window_bounds = array<i64: 4, 128>}, {pipeline_mode = #tpu.pipeline_mode<synchronous>, transform_indices = @transform_1, window_bounds = array<i64: 5, 4>}, {pipeline_mode = #tpu.pipeline_mode<synchronous>, transform_indices = @transform_2, window_bounds = array<i64: 5, 1>}, {pipeline_mode = #tpu.pipeline_mode<synchronous>, transform_indices = @transform_3, window_bounds = array<i64: 5, 5>}, {pipeline_mode = #tpu.pipeline_mode<synchronous>, transform_indices = @transform_4, window_bounds = array<i64: 5, 1>}, {pipeline_mode = #tpu.pipeline_mode<synchronous>, transform_indices = @transform_5, window_bounds = array<i64: 2, 5>}, {pipeline_mode = #tpu.pipeline_mode<synchronous>, transform_indices = @transform_6, window_bounds = array<i64: 2, 1>}, {transform_indices = @transform_7, window_bounds = array<i64: 2, 128>}]} {
    %c0 = arith.constant 0 : index
    %c0_0 = arith.constant 0 : index
    %0 = vector.load %arg1[%c0, %c0_0] : memref<4x128xf32, #tpu.memory_space<vmem>>, vector<4x128xf32>
    %c0_1 = arith.constant 0 : index
    %c0_2 = arith.constant 0 : index
    %1 = vector.load %arg2[%c0_1, %c0_2] : memref<5x4xf32, #tpu.memory_space<vmem>>, vector<5x4xf32>
    %cst = arith.constant dense<0.000000e+00> : vector<5x128xf32>
    %2 = tpu.matmul %1, %0, %cst {dimension_numbers = #tpu.dot_dimension_numbers<[1], [0], [0], [1], [0, 0, 1, 1], [], []>} : vector<5x4xf32>, vector<4x128xf32>, vector<5x128xf32> -> vector<5x128xf32>
    %c0_3 = arith.constant 0 : index
    %c0_4 = arith.constant 0 : index
    %3 = vector.load %arg3[%c0_3, %c0_4] : memref<5x1xf32, #tpu.memory_space<vmem>>, vector<5x1xf32>
    %4 = vector.broadcast %3 : vector<5x1xf32> to vector<5x128xf32>
    %5 = arith.addf %2, %4 : vector<5x128xf32>
    %6 = arith.negf %5 : vector<5x128xf32>
    %7 = math.exp %6 : vector<5x128xf32>
    %cst_5 = arith.constant 1.000000e+00 : f32
    %8 = vector.broadcast %cst_5 : f32 to vector<5x128xf32>
    %9 = arith.addf %8, %7 : vector<5x128xf32>
    %10 = arith.divf %8, %9 : vector<5x128xf32>
    %c0_6 = arith.constant 0 : index
    %c0_7 = arith.constant 0 : index
    %11 = vector.load %arg4[%c0_6, %c0_7] : memref<5x5xf32, #tpu.memory_space<vmem>>, vector<5x5xf32>
    %cst_8 = arith.constant dense<0.000000e+00> : vector<5x128xf32>
    %12 = tpu.matmul %11, %10, %cst_8 {dimension_numbers = #tpu.dot_dimension_numbers<[1], [0], [0], [1], [0, 0, 1, 1], [], []>} : vector<5x5xf32>, vector<5x128xf32>, vector<5x128xf32> -> vector<5x128xf32>
    %c0_9 = arith.constant 0 : index
    %c0_10 = arith.constant 0 : index
    %13 = vector.load %arg5[%c0_9, %c0_10] : memref<5x1xf32, #tpu.memory_space<vmem>>, vector<5x1xf32>
    %14 = vector.broadcast %13 : vector<5x1xf32> to vector<5x128xf32>
    %15 = arith.addf %12, %14 : vector<5x128xf32>
    %16 = arith.negf %15 : vector<5x128xf32>
    %17 = math.exp %16 : vector<5x128xf32>
    %cst_11 = arith.constant 1.000000e+00 : f32
    %18 = vector.broadcast %cst_11 : f32 to vector<5x128xf32>
    %19 = arith.addf %18, %17 : vector<5x128xf32>
    %20 = arith.divf %18, %19 : vector<5x128xf32>
    %c0_12 = arith.constant 0 : index
    %c0_13 = arith.constant 0 : index
    %21 = vector.load %arg6[%c0_12, %c0_13] : memref<2x5xf32, #tpu.memory_space<vmem>>, vector<2x5xf32>
    %cst_14 = arith.constant dense<0.000000e+00> : vector<2x128xf32>
    %22 = tpu.matmul %21, %20, %cst_14 {dimension_numbers = #tpu.dot_dimension_numbers<[1], [0], [0], [1], [0, 0, 1, 1], [], []>} : vector<2x5xf32>, vector<5x128xf32>, vector<2x128xf32> -> vector<2x128xf32>
    %c0_15 = arith.constant 0 : index
    %c0_16 = arith.constant 0 : index
    %23 = vector.load %arg7[%c0_15, %c0_16] : memref<2x1xf32, #tpu.memory_space<vmem>>, vector<2x1xf32>
    %24 = vector.broadcast %23 : vector<2x1xf32> to vector<2x128xf32>
    %25 = arith.addf %22, %24 : vector<2x128xf32>
    %c0_17 = arith.constant 0 : index
    %c0_18 = arith.constant 0 : index
    %26 = vector.load %arg8[%c0_17, %c0_18] : memref<2x128xf32, #tpu.memory_space<vmem>>, vector<2x128xf32>
    tpu.vector_store %arg8[%c0_17, %c0_18], %25 {strides = array<i32>} : memref<2x128xf32, #tpu.memory_space<vmem>>, vector<2x128xf32>,
    return
  }
  func.func @transform_0(%arg0: i32) -> (i32, i32) {
    %c0_i32 = arith.constant 0 : i32
    %c0_i32_0 = arith.constant 0 : i32
    return %c0_i32, %arg0 : i32, i32
  }
  func.func @transform_1(%arg0: i32) -> (i32, i32) {
    %c0_i32 = arith.constant 0 : i32
    %c0_i32_0 = arith.constant 0 : i32
    %c0_i32_1 = arith.constant 0 : i32
    return %c0_i32, %c0_i32_0 : i32, i32
  }
  func.func @transform_2(%arg0: i32) -> (i32, i32) {
    %c0_i32 = arith.constant 0 : i32
    %c0_i32_0 = arith.constant 0 : i32
    %c0_i32_1 = arith.constant 0 : i32
    return %c0_i32, %c0_i32_0 : i32, i32
  }
  func.func @transform_3(%arg0: i32) -> (i32, i32) {
    %c0_i32 = arith.constant 0 : i32
    %c0_i32_0 = arith.constant 0 : i32
    %c0_i32_1 = arith.constant 0 : i32
    return %c0_i32, %c0_i32_0 : i32, i32
  }
  func.func @transform_4(%arg0: i32) -> (i32, i32) {
    %c0_i32 = arith.constant 0 : i32
    %c0_i32_0 = arith.constant 0 : i32
    %c0_i32_1 = arith.constant 0 : i32
    return %c0_i32, %c0_i32_0 : i32, i32
  }
  func.func @transform_5(%arg0: i32) -> (i32, i32) {
    %c0_i32 = arith.constant 0 : i32
    %c0_i32_0 = arith.constant 0 : i32
    %c0_i32_1 = arith.constant 0 : i32
    return %c0_i32, %c0_i32_0 : i32, i32
  }
  func.func @transform_6(%arg0: i32) -> (i32, i32) {
    %c0_i32 = arith.constant 0 : i32
    %c0_i32_0 = arith.constant 0 : i32
    %c0_i32_1 = arith.constant 0 : i32
    return %c0_i32, %c0_i32_0 : i32, i32
  }
  func.func @transform_7(%arg0: i32) -> (i32, i32) {
    %c0_i32 = arith.constant 0 : i32
    %c0_i32_0 = arith.constant 0 : i32
    return %c0_i32, %arg0 : i32, i32
  }
}

</mosaic_0001>

<bundles_post_ra>
// kernel: tpu_custom_call.1
= control target key start
LH: loop header
LB: loop body
LE: loop exit
PB: predicated region body
PF: predicated region fallthrough
CT: control target
= control target key end

     0   :  { %vm39_vm0 = vcmask 1043456   ;;  %vm35_vm1 = vcmask 31744   ;;  %v232_v3 = vmov 0   ;;  %s302_s0 = inlined_call_operand.vmem [shape: f32[4,128], index: 0, kind: input, shape index: {}]   ;;  %s303_s1 = inlined_call_operand.vmem [shape: f32[5,4], index: 1, kind: input, shape index: {}]   ;;  %s304_s2 = inlined_call_operand.vmem [shape: f32[5,1], index: 2, kind: input, shape index: {}]   ;;  %s305_s3 = inlined_call_operand.vmem [shape: f32[5,5], index: 3, kind: input, shape index: {}]   ;;  %s306_s4 = inlined_call_operand.vmem [shape: f32[5,1], index: 4, kind: input, shape index: {}]   ;;  %s307_s5 = inlined_call_operand.vmem [shape: f32[2,5], index: 5, kind: input, shape index: {}]   ;;  %s308_s6 = inlined_call_operand.vmem [shape: f32[2,1], index: 6, kind: input, shape index: {}]   ;;  %s309_s7 = inlined_call_operand.hbm [shape: f32[2,128], index: 7, kind: output, shape index: {}]  }
   0x1   :  { %v27_v0 = vld [vmem:[%s302_s0] sm:$0xf]  ;;  %196 = vset.pattern.permute.xlu0 %v232_v3 }
   0x2   :  { %v28_v1 = vld [vmem:[%s303_s1] sm:$0x1f]  ;;  %186 = vmatpush.msk.msra.mxu0 %vm39_vm0, %v27_v0 }
   0x3   :  { %v29_v2 = vld [vmem:[%s304_s2] sm:$0x1f]  ;;  %187 = vmatmul.msk.f32.vlgmr.msra.gmra.mxu0 %vm35_vm1, %v28_v1 }
   0x4   :  { %12 = vsyncpa [#allocation3], 0  ;;  %32 = vperm.xlu0 %196, %v29_v2   ;;  %197 = vset.pattern.permute.xlu1 %v232_v3  ;;  %v83_v4 = vld [vmem:[%s306_s4] sm:$0x1f]  ;;  %vm93_vm5 = vcmask 1044480   ;;  %vm89_vm7 = vcmask 39936  }
   0x5   :  { %v82_v20 = vld [vmem:[%s305_s3] sm:$0x1f]  ;;  %s233_s9 = smov [#allocation2]   ;;  %s177_s13 = sshll.u32 %s309_s7, 4  ;;  %s178_s13 = int_to_ptr.hbm [resolvable:$true] %s177_s13 }
   0x6   :  { %v137_v24 = vld [vmem:[%s308_s6] sm:$0x3]  ;;  %s175_s10 = sshll.u32 %s233_s9, 4  ;;  %s176_s10 = int_to_ptr.vmem [resolvable:$true] %s175_s10 }
   0x7   :  { %140 = vperm.xlu1 %197, %v137_v24   ;;  %v136_v38 = vld [vmem:[%s307_s5] sm:$0x3] }
   0xc   :  { %86 = vperm.xlu0 %196, %v83_v4  }
  0x76   :  { %v33_v5 = vpop.permute.xlu0 %32 }
  0x79   :  { %v141_v40 = vpop.permute.xlu1 %140 }
  0x7e   :  { %v87_v22 = vpop.permute.xlu0 %86 }
  0x80   :  { %v60_v6 = vpop.f32.mrf.mxu0 }
  0x81   :  { %v61_v7 = vadd.f32 %v60_v6, %v33_v5 }
  0x83   :  { %v188_v8 = vmul.f32 -1.442695, %v61_v7 }
  0x85   :  { %198 = vpow2.f32 %v188_v8 }
  0x8b   :  { %v199_v9 = vpop.eup %198 }
  0x8c   :  { %v66_v10 = vadd.f32 1.0, %v199_v9 }
  0x8e   :  { %200 = vrcp.f32 %v66_v10  ;;  %v78_v14 = vand.u32 2147483648, %v66_v10  ;;  %v76_v16 = vand.u32 2147483647, %v66_v10  ;;  %vm72_vm3 = vweird.f32 %v66_v10 }
  0x90   :  { %v79_v18 = vor.u32 1.1754944e-38, %v78_v14  ;;  %vm77_vm6 = vcmp.eq.f32.partialorder %v76_v16, 8.507059e+37 }
  0x94   :  { %v201_v11 = vpop.eup %200 }
  0x95   :  { %v68_v12 = vmul.f32 %v201_v11, %v66_v10  ;;  %vm73_vm2 = vweird.f32 %v201_v11 }
  0x96   :  { %vm74_vm4 = vmor %vm72_vm3, %vm73_vm2 }
  0x97   :  { %v69_v13 = vsub.f32 1.0, %v68_v12 }
  0x99   :  { %v70_v15 = vmul.f32 %v201_v11, %v69_v13 }
  0x9b   :  { %v71_v17 = vadd.f32 %v201_v11, %v70_v15 }
  0x9d   :  { %v75_v19 = vsel %vm74_vm4, %v201_v11, %v71_v17 }
  0x9e   :  { %v80_v21 = vsel %vm77_vm6, %v79_v18, %v75_v19 }
  0x9f   :  { %189 = vmatpush.msk.msra.mxu1 %vm93_vm5, %v80_v21 }
  0xa0   :  { %190 = vmatmul.msk.f32.vlgmr.msra.gmra.mxu1 %vm89_vm7, %v82_v20 }
 0x11d   :  { %v114_v23 = vpop.f32.mrf.mxu1 }
 0x11e   :  { %v115_v25 = vadd.f32 %v114_v23, %v87_v22 }
 0x120   :  { %v191_v26 = vmul.f32 -1.442695, %v115_v25 }
 0x122   :  { %202 = vpow2.f32 %v191_v26 }
 0x128   :  { %v203_v27 = vpop.eup %202 }
 0x129   :  { %v120_v28 = vadd.f32 1.0, %v203_v27 }
 0x12b   :  { %204 = vrcp.f32 %v120_v28  ;;  %v132_v32 = vand.u32 2147483648, %v120_v28  ;;  %v130_v34 = vand.u32 2147483647, %v120_v28  ;;  %vm126_vm9 = vweird.f32 %v120_v28 }
 0x12d   :  { %v133_v36 = vor.u32 1.1754944e-38, %v132_v32  ;;  %vm131_vm11 = vcmp.eq.f32.partialorder %v130_v34, 8.507059e+37 }
 0x131   :  { %v205_v29 = vpop.eup %204 }
 0x132   :  { %v122_v30 = vmul.f32 %v205_v29, %v120_v28  ;;  %vm127_vm8 = vweird.f32 %v205_v29 }
 0x133   :  { %vm128_vm10 = vmor %vm126_vm9, %vm127_vm8 }
 0x134   :  { %v123_v31 = vsub.f32 1.0, %v122_v30 }
 0x136   :  { %v124_v33 = vmul.f32 %v205_v29, %v123_v31 }
 0x138   :  { %v125_v35 = vadd.f32 %v205_v29, %v124_v33 }
 0x13a   :  { %v129_v37 = vsel %vm128_vm10, %v205_v29, %v125_v35 }
 0x13b   :  { %v134_v39 = vsel %vm131_vm11, %v133_v36, %v129_v37 }
 0x13c   :  { %192 = vmatpush.msk.msra.mxu2 %vm93_vm5, %v134_v39 }
 0x13d   :  { %193 = vmatmul.msk.f32.vlgmr.msra.gmra.mxu2 %vm89_vm7, %v136_v38 }
 0x1c0   :  { %v166_v41 = vpop.f32.mrf.mxu2 }
 0x1c1   :  { %v167_v42 = vadd.f32 %v166_v41, %v141_v40 }
 0x1c3   :  { %169 = vst [vmem:[#allocation2] sm:$0x3] %v167_v42 }
 0x1c4   :  { %180 = dma.vmem_to_hbm [thread:$0]  %s176_s10, 32, %s178_s13, [#allocation3]  }
 0x1c5   :  { %230 = dma.done.wait [#allocation3], 32  }
 0x1c6   :  { %231 = vsyncadd [#allocation3], 4294967264 }
 0x1c7   :  { %185 = vsyncpa [#allocation3], 1 }

</bundles_post_ra>
